<compile_context>
chip_gen: v6e
topology: v6e:2x2x1
jax: 0.10.0
libtpu: 0.0.40
codegen_flags: <defaults>
</compile_context>

<pallas_src>
import functools

import jax
import jax.numpy as jnp
from jax.experimental import pallas as pl
from jax.experimental.pallas import tpu as pltpu

BN_EPS = 1e-5


def _round_up(x, m):
    return ((x + m - 1) // m) * m


def mlp_head_kernel(x_ref, w1_ref, w2_ref, p_ref, o_ref, *scratch,
                    n_rows, tn, cache_h, ragged):
    if cache_h:
        hcache_ref, sum_ref, sumsq_ref = scratch
    else:
        hcache_ref = None
        sum_ref, sumsq_ref = scratch

    phase = pl.program_id(0)
    tile = pl.program_id(1)
    n_tiles = pl.num_programs(1)
    hp = w1_ref.shape[1]
    proj = w2_ref.shape[1]

    def compute_h():
        # Linear 1 on the MXU (bf16 in, f32 accumulate).  b1 is omitted: it is
        # a provable no-op under train-mode BatchNorm's mean subtraction.
        h = jnp.dot(x_ref[...].astype(jnp.bfloat16), w1_ref[...],
                    preferred_element_type=jnp.float32)         # (tn, hp) f32
        if ragged:
            # Rows past n_rows in the (padded) last batch tile may contain
            # garbage; zero them so the BN statistics stay exact.  jnp.where
            # (not a multiply) so NaN/inf garbage cannot leak through.
            row = tile * tn + jax.lax.broadcasted_iota(jnp.int32, h.shape, 0)
            h = jnp.where(row < n_rows, h, 0.0)
        return h

    @pl.when(phase == 0)
    def _stats_pass():
        @pl.when(tile == 0)
        def _init():
            sum_ref[...] = jnp.zeros_like(sum_ref)
            sumsq_ref[...] = jnp.zeros_like(sumsq_ref)
            # Defensive: all phase-0 steps pin the output to block (0, 0).
            # Under current revisit semantics it is never written back during
            # phase 0, but if it ever were, zeros (overwritten by phase 1)
            # are benign instead of garbage.
            o_ref[...] = jnp.zeros_like(o_ref)

        h = compute_h()
        if cache_h:
            start = pl.multiple_of(tile * tn, tn)
            hcache_ref[pl.ds(start, tn), :] = h
        # One-pass moments: sum(h) and sum(h*h).
        sum_ref[...] = sum_ref[...] + jnp.sum(h, axis=0, keepdims=True)
        sumsq_ref[...] = sumsq_ref[...] + jnp.sum(h * h, axis=0, keepdims=True)

        @pl.when(tile == n_tiles - 1)
        def _finalize():
            inv_n = 1.0 / n_rows
            mu = sum_ref[...] * inv_n
            # E[h^2] - mu^2 is cancellation-prone in f32: clamp at 0.
            var = jnp.maximum(sumsq_ref[...] * inv_n - mu * mu, 0.0)
            scale = p_ref[0:1, :hp] * jax.lax.rsqrt(var + BN_EPS)  # gamma*rstd
            shift = p_ref[1:2, :hp] - mu * scale                   # beta-mu*scale
            sum_ref[...] = scale        # reuse moment buffers as scale/shift
            sumsq_ref[...] = shift

    @pl.when(phase == 1)
    def _apply_pass():
        if cache_h:
            start = pl.multiple_of(tile * tn, tn)
            h = hcache_ref[pl.ds(start, tn), :]
        else:
            h = compute_h()
        scale = sum_ref[...]
        shift = sumsq_ref[...]
        r = jnp.maximum(h * scale + shift, 0.0)       # fused BN affine + ReLU
        # Linear 2 on the MXU, producing the final (tn, proj) width directly.
        out = jnp.dot(r.astype(jnp.bfloat16), w2_ref[...],
                      preferred_element_type=jnp.float32) + p_ref[2:3, :proj]
        o_ref[...] = out.astype(o_ref.dtype)


def mlp_head(x, w1, b1, gamma, beta, w2, b2):
    """x: (N, C); w1: (H, C) and w2: (P, H) in PyTorch (out, in) layout.

    b1 is accepted for API parity with nn.Linear but intentionally unused:
    train-mode BatchNorm's mean subtraction cancels it exactly.
    """
    del b1
    n, c = x.shape
    hdim = w1.shape[0]
    proj = w2.shape[0]

    hp = _round_up(hdim, 128)           # lane-full hidden width
    pw = max(hp, proj)

    # Glue (one pass over the tiny weight tensors): transpose, zero-pad hidden
    # to the 128-lane width, cast to bf16 for the native MXU path.
    w1p = jnp.zeros((c, hp), jnp.bfloat16).at[:, :hdim].set(
        w1.T.astype(jnp.bfloat16))
    w2p = jnp.zeros((hp, proj), jnp.bfloat16).at[:hdim, :].set(
        w2.T.astype(jnp.bfloat16))
    params = jnp.zeros((3, pw), jnp.float32)
    params = params.at[0, :hdim].set(gamma.astype(jnp.float32))   # gamma
    params = params.at[1, :hdim].set(beta.astype(jnp.float32))    # beta
    params = params.at[2, :proj].set(b2.astype(jnp.float32))      # b2

    tn = min(1024, _round_up(n, 8))     # batch tile, 8-sublane aligned
    nt = pl.cdiv(n, tn)
    ragged = (n % tn) != 0

    # VMEM plan (bytes): resident weights + double-buffered x/out blocks +
    # stat refs (+ the h cache when it fits).
    base = (c * hp * 2 + hp * proj * 2 + 3 * pw * 4        # weights/params
            + 2 * tn * c * 4                               # x double buffer
            + 2 * tn * proj * 4                            # out double buffer
            + 2 * 8 * max(hp, 128) * 4)                    # sum/sumsq (padded)
    cache_bytes = nt * tn * hp * 4
    budget = 40 * 2 ** 20               # conservative for v7x's 64 MiB phys
    cache_h = (base + cache_bytes) <= budget
    need = base + (cache_bytes if cache_h else 0)
    vmem_limit = int(min(56 * 2 ** 20, max(32 * 2 ** 20, need + 8 * 2 ** 20)))

    if cache_h:
        # Phase 1 never reads x: pin it to block 0 so no new x DMAs are issued.
        x_index = lambda p, i: (i * (1 - p), 0)
        scratch = [pltpu.VMEM((nt * tn, hp), jnp.float32),   # h cache
                   pltpu.VMEM((1, hp), jnp.float32),         # sum  -> scale
                   pltpu.VMEM((1, hp), jnp.float32)]         # sumsq -> shift
    else:
        x_index = lambda p, i: (i, 0)
        scratch = [pltpu.VMEM((1, hp), jnp.float32),
                   pltpu.VMEM((1, hp), jnp.float32)]

    kernel = functools.partial(mlp_head_kernel, n_rows=n, tn=tn,
                               cache_h=cache_h, ragged=ragged)

    return pl.pallas_call(
        kernel,
        out_shape=jax.ShapeDtypeStruct((n, proj), jnp.float32),
        grid_spec=pltpu.PrefetchScalarGridSpec(
            num_scalar_prefetch=0,
            grid=(2, nt),                                  # (phase, batch tile)
            in_specs=[
                pl.BlockSpec((tn, c), x_index),                 # x tile
                pl.BlockSpec((c, hp), lambda p, i: (0, 0)),     # W1 (resident)
                pl.BlockSpec((hp, proj), lambda p, i: (0, 0)),  # W2 (resident)
                pl.BlockSpec((3, pw), lambda p, i: (0, 0)),     # gamma/beta/b2
            ],
            # Phase 0 pins the output to block (0, 0) (never written back);
            # phase 1 writes block i.
            out_specs=pl.BlockSpec((tn, proj), lambda p, i: (p * i, 0)),
            scratch_shapes=scratch,
        ),
        compiler_params=pltpu.CompilerParams(
            dimension_semantics=("arbitrary", "arbitrary"),
            vmem_limit_bytes=vmem_limit),
    )(x, w1p, w2p, params)


def _reference(x, w1, b1, gamma, beta, w2, b2, matmul_dtype=jnp.float32):
    """Straight port of the PyTorch module (BatchNorm1d in training mode)."""
    h = jnp.dot(x.astype(matmul_dtype), w1.T.astype(matmul_dtype),
                preferred_element_type=jnp.float32) + b1
    mu = h.mean(0, keepdims=True)
    var = ((h - mu) ** 2).mean(0, keepdims=True)
    hn = (h - mu) * jax.lax.rsqrt(var + BN_EPS) * gamma + beta
    r = jnp.maximum(hn, 0.0)
    return jnp.dot(r.astype(matmul_dtype), w2.T.astype(matmul_dtype),
                   preferred_element_type=jnp.float32) + b2


if __name__ == "__main__":
    # MLPHead(in_channels=32, mlp_hidden_size=64, projection_size=16), batch 8.
    N, C, H, P = 8, 32, 64, 16

    key = jax.random.PRNGKey(0)
    kx, kw1, kb1, kw2, kb2, kg, kbe = jax.random.split(key, 7)

    x = jax.random.normal(kx, (N, C), jnp.float32)
    lim1 = 1.0 / (C ** 0.5)
    w1 = jax.random.uniform(kw1, (H, C), jnp.float32, -lim1, lim1)
    b1 = jax.random.uniform(kb1, (H,), jnp.float32, -lim1, lim1)
    lim2 = 1.0 / (H ** 0.5)
    w2 = jax.random.uniform(kw2, (P, H), jnp.float32, -lim2, lim2)
    b2 = jax.random.uniform(kb2, (P,), jnp.float32, -lim2, lim2)
    gamma = 1.0 + 0.1 * jax.random.normal(kg, (H,), jnp.float32)
    beta = 0.1 * jax.random.normal(kbe, (H,), jnp.float32)

    out = jax.block_until_ready(mlp_head(x, w1, b1, gamma, beta, w2, b2))
    assert out.shape == (N, P)

    # Tight check vs. a reference that uses the same bf16 MXU inputs.
    ref_bf16 = _reference(x, w1, b1, gamma, beta, w2, b2,
                          matmul_dtype=jnp.bfloat16)
    assert jnp.allclose(out, ref_bf16, atol=5e-3, rtol=5e-3), \
        float(jnp.max(jnp.abs(out - ref_bf16)))

    # Semantic check vs. the pure-f32 PyTorch-equivalent forward (looser tol
    # only because the kernel intentionally feeds the MXU bf16).
    ref_f32 = _reference(x, w1, b1, gamma, beta, w2, b2,
                         matmul_dtype=jnp.float32)
    assert jnp.allclose(out, ref_f32, atol=5e-2, rtol=5e-2), \
        float(jnp.max(jnp.abs(out - ref_f32)))

    print("KERNEL_OK")
</pallas_src>

<mosaic_0001>
module attributes {stable_mosaic.version = 11 : i64} {
  func.func @mlp_head_kernel(%arg0: i32, %arg1: i32, %arg2: memref<8x32xf32, #tpu.memory_space<vmem>>, %arg3: memref<32x128xbf16, #tpu.memory_space<vmem>>, %arg4: memref<128x16xbf16, #tpu.memory_space<vmem>>, %arg5: memref<3x128xf32, #tpu.memory_space<vmem>>, %arg6: memref<8x16xf32, #tpu.memory_space<vmem>>, %arg7: memref<8x128xf32, #tpu.memory_space<vmem>>, %arg8: memref<1x128xf32, #tpu.memory_space<vmem>>, %arg9: memref<1x128xf32, #tpu.memory_space<vmem>>) attributes {dimension_semantics = [#tpu.dimension_semantics<arbitrary>, #tpu.dimension_semantics<arbitrary>], iteration_bounds = array<i64: 2, 1>, scalar_prefetch = 0 : i64, scratch_operands = 3 : i64, tpu.core_type = #tpu.core_type<tc>, window_params = [{transform_indices = @transform_0, window_bounds = array<i64: 8, 32>}, {pipeline_mode = #tpu.pipeline_mode<synchronous>, transform_indices = @transform_1, window_bounds = array<i64: 32, 128>}, {pipeline_mode = #tpu.pipeline_mode<synchronous>, transform_indices = @transform_2, window_bounds = array<i64: 128, 16>}, {pipeline_mode = #tpu.pipeline_mode<synchronous>, transform_indices = @transform_3, window_bounds = array<i64: 3, 128>}, {transform_indices = @transform_4, window_bounds = array<i64: 8, 16>}]} {
    %c0_i32 = arith.constant 0 : i32
    %0 = arith.cmpi eq, %arg0, %c0_i32 : i32
    %1 = arith.extui %0 : i1 to i32
    %c0_i32_0 = arith.constant 0 : i32
    %2 = arith.cmpi ne, %1, %c0_i32_0 : i32
    scf.if %2 {
      %c0_i32_2 = arith.constant 0 : i32
      %6 = arith.cmpi eq, %arg1, %c0_i32_2 : i32
      %7 = arith.extui %6 : i1 to i32
      %c0_i32_3 = arith.constant 0 : i32
      %8 = arith.cmpi ne, %7, %c0_i32_3 : i32
      scf.if %8 {
        %cst_20 = arith.constant 0.000000e+00 : f32
        %31 = vector.broadcast %cst_20 : f32 to vector<1x128xf32>
        %c0_21 = arith.constant 0 : index
        %c0_22 = arith.constant 0 : index
        %32 = vector.load %arg8[%c0_21, %c0_22] : memref<1x128xf32, #tpu.memory_space<vmem>>, vector<1x128xf32>
        tpu.vector_store %arg8[%c0_21, %c0_22], %31 {strides = array<i32>} : memref<1x128xf32, #tpu.memory_space<vmem>>, vector<1x128xf32>,
        %cst_23 = arith.constant 0.000000e+00 : f32
        %33 = vector.broadcast %cst_23 : f32 to vector<1x128xf32>
        %c0_24 = arith.constant 0 : index
        %c0_25 = arith.constant 0 : index
        %34 = vector.load %arg9[%c0_24, %c0_25] : memref<1x128xf32, #tpu.memory_space<vmem>>, vector<1x128xf32>
        tpu.vector_store %arg9[%c0_24, %c0_25], %33 {strides = array<i32>} : memref<1x128xf32, #tpu.memory_space<vmem>>, vector<1x128xf32>,
        %cst_26 = arith.constant 0.000000e+00 : f32
        %35 = vector.broadcast %cst_26 : f32 to vector<8x16xf32>
        %c0_27 = arith.constant 0 : index
        %c0_28 = arith.constant 0 : index
        %36 = vector.load %arg6[%c0_27, %c0_28] : memref<8x16xf32, #tpu.memory_space<vmem>>, vector<8x16xf32>
        tpu.vector_store %arg6[%c0_27, %c0_28], %35 {strides = array<i32>} : memref<8x16xf32, #tpu.memory_space<vmem>>, vector<8x16xf32>,
      } else {
      }
      %c0 = arith.constant 0 : index
      %c0_4 = arith.constant 0 : index
      %9 = vector.load %arg2[%c0, %c0_4] : memref<8x32xf32, #tpu.memory_space<vmem>>, vector<8x32xf32>
      %10 = arith.truncf %9 : vector<8x32xf32> to vector<8x32xbf16>
      %c0_5 = arith.constant 0 : index
      %c0_6 = arith.constant 0 : index
      %11 = vector.load %arg3[%c0_5, %c0_6] : memref<32x128xbf16, #tpu.memory_space<vmem>>, vector<32x128xbf16>
      %cst = arith.constant dense<0.000000e+00> : vector<8x128xf32>
      %12 = tpu.matmul %10, %11, %cst {dimension_numbers = #tpu.dot_dimension_numbers<[1], [0], [0], [1], [0, 0, 1, 1], [], []>} : vector<8x32xbf16>, vector<32x128xbf16>, vector<8x128xf32> -> vector<8x128xf32>
      %c8_i32 = arith.constant 8 : i32
      %13 = arith.muli %arg1, %c8_i32 : i32
      %14 = tpu.assume_multiple %13, 8 : i32
      %15 = arith.index_cast %14 : i32 to index
      %c0_7 = arith.constant 0 : index
      %16 = vector.load %arg7[%15, %c0_7] : memref<8x128xf32, #tpu.memory_space<vmem>>, vector<8x128xf32>
      tpu.vector_store %arg7[%15, %c0_7], %12 {strides = array<i32>} : memref<8x128xf32, #tpu.memory_space<vmem>>, vector<8x128xf32>,
      %c0_8 = arith.constant 0 : index
      %c0_9 = arith.constant 0 : index
      %17 = vector.load %arg8[%c0_8, %c0_9] : memref<1x128xf32, #tpu.memory_space<vmem>>, vector<1x128xf32>
      %cst_10 = arith.constant dense<0.000000e+00> : vector<128xf32>
      %18 = vector.multi_reduction <add>, %12, %cst_10 [0] : vector<8x128xf32> to vector<128xf32>
      %19 = vector.shape_cast %18 : vector<128xf32> to vector<1x128xf32>
      %20 = arith.addf %17, %19 : vector<1x128xf32>
      %c0_11 = arith.constant 0 : index
      %c0_12 = arith.constant 0 : index
      %21 = vector.load %arg8[%c0_11, %c0_12] : memref<1x128xf32, #tpu.memory_space<vmem>>, vector<1x128xf32>
      tpu.vector_store %arg8[%c0_11, %c0_12], %20 {strides = array<i32>} : memref<1x128xf32, #tpu.memory_space<vmem>>, vector<1x128xf32>,
      %c0_13 = arith.constant 0 : index
      %c0_14 = arith.constant 0 : index
      %22 = vector.load %arg9[%c0_13, %c0_14] : memref<1x128xf32, #tpu.memory_space<vmem>>, vector<1x128xf32>
      %23 = arith.mulf %12, %12 : vector<8x128xf32>
      %cst_15 = arith.constant dense<0.000000e+00> : vector<128xf32>
      %24 = vector.multi_reduction <add>, %23, %cst_15 [0] : vector<8x128xf32> to vector<128xf32>
      %25 = vector.shape_cast %24 : vector<128xf32> to vector<1x128xf32>
      %26 = arith.addf %22, %25 : vector<1x128xf32>
      %c0_16 = arith.constant 0 : index
      %c0_17 = arith.constant 0 : index
      %27 = vector.load %arg9[%c0_16, %c0_17] : memref<1x128xf32, #tpu.memory_space<vmem>>, vector<1x128xf32>
      tpu.vector_store %arg9[%c0_16, %c0_17], %26 {strides = array<i32>} : memref<1x128xf32, #tpu.memory_space<vmem>>, vector<1x128xf32>,
      %c0_i32_18 = arith.constant 0 : i32
      %28 = arith.cmpi eq, %arg1, %c0_i32_18 : i32
      %29 = arith.extui %28 : i1 to i32
      %c0_i32_19 = arith.constant 0 : i32
      %30 = arith.cmpi ne, %29, %c0_i32_19 : i32
      scf.if %30 {
        %c0_20 = arith.constant 0 : index
        %c0_21 = arith.constant 0 : index
        %31 = vector.load %arg8[%c0_20, %c0_21] : memref<1x128xf32, #tpu.memory_space<vmem>>, vector<1x128xf32>
        %cst_22 = arith.constant 1.250000e-01 : f32
        %32 = vector.broadcast %cst_22 : f32 to vector<1x128xf32>
        %33 = arith.mulf %31, %32 : vector<1x128xf32>
        %c0_23 = arith.constant 0 : index
        %c0_24 = arith.constant 0 : index
        %34 = vector.load %arg9[%c0_23, %c0_24] : memref<1x128xf32, #tpu.memory_space<vmem>>, vector<1x128xf32>
        %cst_25 = arith.constant 1.250000e-01 : f32
        %35 = vector.broadcast %cst_25 : f32 to vector<1x128xf32>
        %36 = arith.mulf %34, %35 : vector<1x128xf32>
        %37 = arith.mulf %33, %33 : vector<1x128xf32>
        %38 = arith.subf %36, %37 : vector<1x128xf32>
        %cst_26 = arith.constant 0.000000e+00 : f32
        %39 = vector.broadcast %cst_26 : f32 to vector<1x128xf32>
        %40 = arith.maximumf %38, %39 : vector<1x128xf32>
        %c0_27 = arith.constant 0 : index
        %c0_28 = arith.constant 0 : index
        %41 = vector.load %arg5[%c0_27, %c0_28] : memref<3x128xf32, #tpu.memory_space<vmem>>, vector<1x128xf32>
        %cst_29 = arith.constant 9.99999974E-6 : f32
        %42 = vector.broadcast %cst_29 : f32 to vector<1x128xf32>
        %43 = arith.addf %40, %42 : vector<1x128xf32>
        %44 = math.rsqrt %43 : vector<1x128xf32>
        %45 = arith.mulf %41, %44 : vector<1x128xf32>
        %c1 = arith.constant 1 : index
        %c0_30 = arith.constant 0 : index
        %46 = vector.load %arg5[%c1, %c0_30] : memref<3x128xf32, #tpu.memory_space<vmem>>, vector<1x128xf32>
        %47 = arith.mulf %33, %45 : vector<1x128xf32>
        %48 = arith.subf %46, %47 : vector<1x128xf32>
        %c0_31 = arith.constant 0 : index
        %c0_32 = arith.constant 0 : index
        %49 = vector.load %arg8[%c0_31, %c0_32] : memref<1x128xf32, #tpu.memory_space<vmem>>, vector<1x128xf32>
        tpu.vector_store %arg8[%c0_31, %c0_32], %45 {strides = array<i32>} : memref<1x128xf32, #tpu.memory_space<vmem>>, vector<1x128xf32>,
        %c0_33 = arith.constant 0 : index
        %c0_34 = arith.constant 0 : index
        %50 = vector.load %arg9[%c0_33, %c0_34] : memref<1x128xf32, #tpu.memory_space<vmem>>, vector<1x128xf32>
        tpu.vector_store %arg9[%c0_33, %c0_34], %48 {strides = array<i32>} : memref<1x128xf32, #tpu.memory_space<vmem>>, vector<1x128xf32>,
      } else {
      }
    } else {
    }
    %c1_i32 = arith.constant 1 : i32
    %3 = arith.cmpi eq, %arg0, %c1_i32 : i32
    %4 = arith.extui %3 : i1 to i32
    %c0_i32_1 = arith.constant 0 : i32
    %5 = arith.cmpi ne, %4, %c0_i32_1 : i32
    scf.if %5 {
      %c8_i32 = arith.constant 8 : i32
      %6 = arith.muli %arg1, %c8_i32 : i32
      %7 = tpu.assume_multiple %6, 8 : i32
      %8 = arith.index_cast %7 : i32 to index
      %c0 = arith.constant 0 : index
      %9 = vector.load %arg7[%8, %c0] : memref<8x128xf32, #tpu.memory_space<vmem>>, vector<8x128xf32>
      %c0_2 = arith.constant 0 : index
      %c0_3 = arith.constant 0 : index
      %10 = vector.load %arg8[%c0_2, %c0_3] : memref<1x128xf32, #tpu.memory_space<vmem>>, vector<1x128xf32>
      %c0_4 = arith.constant 0 : index
      %c0_5 = arith.constant 0 : index
      %11 = vector.load %arg9[%c0_4, %c0_5] : memref<1x128xf32, #tpu.memory_space<vmem>>, vector<1x128xf32>
      %12 = vector.broadcast %10 : vector<1x128xf32> to vector<8x128xf32>
      %13 = arith.mulf %9, %12 : vector<8x128xf32>
      %14 = vector.broadcast %11 : vector<1x128xf32> to vector<8x128xf32>
      %15 = arith.addf %13, %14 : vector<8x128xf32>
      %cst = arith.constant 0.000000e+00 : f32
      %16 = vector.broadcast %cst : f32 to vector<8x128xf32>
      %17 = arith.maximumf %15, %16 : vector<8x128xf32>
      %18 = arith.truncf %17 : vector<8x128xf32> to vector<8x128xbf16>
      %c0_6 = arith.constant 0 : index
      %c0_7 = arith.constant 0 : index
      %19 = vector.load %arg4[%c0_6, %c0_7] : memref<128x16xbf16, #tpu.memory_space<vmem>>, vector<128x16xbf16>
      %cst_8 = arith.constant dense<0.000000e+00> : vector<8x16xf32>
      %20 = tpu.matmul %18, %19, %cst_8 {dimension_numbers = #tpu.dot_dimension_numbers<[1], [0], [0], [1], [0, 0, 1, 1], [], []>} : vector<8x128xbf16>, vector<128x16xbf16>, vector<8x16xf32> -> vector<8x16xf32>
      %c2 = arith.constant 2 : index
      %c0_9 = arith.constant 0 : index
      %21 = vector.load %arg5[%c2, %c0_9] : memref<3x128xf32, #tpu.memory_space<vmem>>, vector<1x16xf32>
      %22 = vector.broadcast %21 : vector<1x16xf32> to vector<8x16xf32>
      %23 = arith.addf %20, %22 : vector<8x16xf32>
      %c0_10 = arith.constant 0 : index
      %c0_11 = arith.constant 0 : index
      %24 = vector.load %arg6[%c0_10, %c0_11] : memref<8x16xf32, #tpu.memory_space<vmem>>, vector<8x16xf32>
      tpu.vector_store %arg6[%c0_10, %c0_11], %23 {strides = array<i32>} : memref<8x16xf32, #tpu.memory_space<vmem>>, vector<8x16xf32>,
    } else {
    }
    return
  }
  func.func @transform_0(%arg0: i32, %arg1: i32) -> (i32, i32) {
    %c1_i32 = arith.constant 1 : i32
    %0 = arith.subi %c1_i32, %arg0 : i32
    %1 = arith.muli %arg1, %0 : i32
    %c0_i32 = arith.constant 0 : i32
    %c0_i32_0 = arith.constant 0 : i32
    return %1, %c0_i32 : i32, i32
  }
  func.func @transform_1(%arg0: i32, %arg1: i32) -> (i32, i32) {
    %c0_i32 = arith.constant 0 : i32
    %c0_i32_0 = arith.constant 0 : i32
    %c0_i32_1 = arith.constant 0 : i32
    return %c0_i32, %c0_i32_0 : i32, i32
  }
  func.func @transform_2(%arg0: i32, %arg1: i32) -> (i32, i32) {
    %c0_i32 = arith.constant 0 : i32
    %c0_i32_0 = arith.constant 0 : i32
    %c0_i32_1 = arith.constant 0 : i32
    return %c0_i32, %c0_i32_0 : i32, i32
  }
  func.func @transform_3(%arg0: i32, %arg1: i32) -> (i32, i32) {
    %c0_i32 = arith.constant 0 : i32
    %c0_i32_0 = arith.constant 0 : i32
    %c0_i32_1 = arith.constant 0 : i32
    return %c0_i32, %c0_i32_0 : i32, i32
  }
  func.func @transform_4(%arg0: i32, %arg1: i32) -> (i32, i32) {
    %0 = arith.muli %arg0, %arg1 : i32
    %c0_i32 = arith.constant 0 : i32
    %c0_i32_0 = arith.constant 0 : i32
    return %0, %c0_i32 : i32, i32
  }
}

</mosaic_0001>

<bundles_post_ra>
// kernel: tpu_custom_call.1
= control target key start
LH: loop header
LB: loop body
LE: loop exit
PB: predicated region body
PF: predicated region fallthrough
CT: control target
= control target key end

     0   :  { %9 = vsyncpa [#allocation6], 0  ;;  %s851_s0 = inlined_call_operand.vmem [shape: f32[8,32], index: 0, kind: input, shape index: {}]   ;;  %s852_s1 = inlined_call_operand.vmem [shape: bf16[32,128], index: 1, kind: input, shape index: {}]   ;;  %s853_s2 = inlined_call_operand.vmem [shape: bf16[128,16], index: 2, kind: input, shape index: {}]   ;;  %s854_s3 = inlined_call_operand.vmem [shape: f32[3,128], index: 3, kind: input, shape index: {}]   ;;  %s855_s4 = inlined_call_operand.hbm [shape: f32[8,16], index: 4, kind: output, shape index: {}]  }
   0x1   :  { %11 = vsyncpa [#allocation6 + $0x1], 0  ;;  %s760_s15 = smov 0   ;;  %s762_s16 = smov 0  }
   0x2   :  { %s764_s17 = smov 0  }
   0x3 LB: > { %s560_s18 = sadd.s32 4294967295, %s728_s17   ;;  %s561_s19 = sadd.s32 4294967294, %s728_s17   ;;  %s728_s17 = sphi %s764_s17, %s17_s17   ;;  %s724_s16 = sphi %s762_s16, %s858_s16   ;;  %s720_s15 = sphi %s760_s15, %s857_s15  }
   0x4   : > { %s29_s20 = sadd.s32 1, %s724_s16  ;;  %p565_p0 = scmp.ge.s32.totalorder %s728_s17, 1 }
   0x5   : > { %p31_p1 = scmp.ge.s32.totalorder %s29_s20, 2  ;;  %p186_p2 = scmp.lt.s32.totalorder %s728_s17, 3 }
   0x7   : > { %s860_s20 = smov (%p31_p1, %s29_s20), 0  ;;  %p187_p3 = pnand %p565_p0, %p186_p2 }
   0x8   : > { %p566_p4 = scmp.ne.s32.totalorder (!%p187_p3), %s720_s15, 0 }
   0x9   : > { %190 = sbr.rel (%p187_p3) target bundleno = 526 (0x20e), region = 36 }
   0xe   : > { %226 = sbr.rel (%p566_p4) target bundleno = 274 (0x112), region = 40 }
  0x13   : > { %vm233_vm0 = vcmask 130048   ;;  %v730_v0 = vmov 0.0   ;;  %v666_v1 = vld [vmem:[%s852_s1 + $0x8] sm:$0xff]   ;;  %vm731_vm1 = vmmov 0   ;;  %v667_v2 = vld [vmem:[%s852_s1] sm:$0xff]   ;;  %vm253_vm2 = vcmask 261120  }
  0x14   : > { %231 = vst [vmem:[#allocation3] sm:$0x1] %v730_v0  ;;  %232 = vst [vmem:[#allocation4] sm:$0x1] %v730_v0  ;;  %598 = vmatprep.subr.bf16.mxu0 %v730_v0  ;;  %602 = vmatprep.mubr.msk.bf16.mxu0 %vm731_vm1, %v730_v0  ;;  %v235_v3 = vld [vmem:[%s851_s0] sm:$0xff] }
  0x15   : > { %234 = vst.msk [vmem:[#allocation5] sm:$0xff] %vm233_vm0, %v730_v0  ;;  %599 = vmatpush3.bf16.msra.mxu0 %v666_v1  ;;  %v236_v4 = vpack.c.bf16 %v235_v3, %v235_v3  ;;  %v329_v34 = vld [vmem:[%s854_s3] sm:$0x1]  ;;  %v333_v37 = vld [vmem:[%s854_s3 + $0x1] sm:$0x1] }
  0x16   : > { %600 = vmatprep.subr.bf16.mxu0 %v730_v0 }
  0x19   : > { %601 = vmatpush3.bf16.msra.mxu0 %v667_v2 }
  0x1b   : > { %v300_v19 = vld [vmem:[#allocation3] sm:$0x1]  ;;  %v309_v22 = vld [vmem:[#allocation4] sm:$0x1] }
  0x1c   : > { %603 = vmatmul.mubr.msk.bf16.vlgmr.msra.gmra.mxu0 %vm253_vm2, %v236_v4 }
  0xdc   : > { %v291_v5 = vpop.f32.mrf.mxu0 }
  0xdd   : > { %299 = vst [vmem:[#allocation2] sm:$0xff] %v291_v5  ;;  %v301_v6 = vrot.slane %v291_v5, 4  ;;  %v310_v7 = vmul.f32 %v291_v5, %v291_v5 }
  0xde   : > { %v604_v8 = vpop.f32.mrf.mxu0 }
  0xdf   : > { %v302_v9 = vadd.f32 %v301_v6, %v291_v5  ;;  %v311_v10 = vrot.slane %v310_v7, 4 }
  0xe0   : > { %v294_v11 = vpop.f32.mrf.mxu0 }
  0xe1   : > { %v303_v12 = vrot.slane %v302_v9, 2  ;;  %v312_v13 = vadd.f32 %v311_v10, %v310_v7 }
  0xe2   : > { %v605_v14 = vpop.f32.mrf.mxu0 }
  0xe3   : > { %v304_v15 = vadd.f32 %v303_v12, %v302_v9  ;;  %v313_v16 = vrot.slane %v312_v13, 2 }
  0xe5   : > { %v305_v17 = vrot.slane %v304_v15, 1  ;;  %v314_v18 = vadd.f32 %v313_v16, %v312_v13 }
  0xe7   : > { %v306_v20 = vadd.f32 %v305_v17, %v304_v15  ;;  %v315_v21 = vrot.slane %v314_v18, 1 }
  0xe9   : > { %v307_v23 = vadd.f32 %v306_v20, %v300_v19  ;;  %v316_v24 = vadd.f32 %v315_v21, %v314_v18 }
  0xeb   : > { %308 = vst [vmem:[#allocation3] sm:$0x1] %v307_v23  ;;  %v317_v25 = vadd.f32 %v316_v24, %v309_v22 }
  0xed   : > { %318 = vst [vmem:[#allocation4] sm:$0x1] %v317_v25 }
  0xf2   : > { %v322_v26 = vld [vmem:[#allocation3] sm:$0x1] }
  0xf3   : > { %v323_v27 = vmul.f32 0.125, %v322_v26 }
  0xf4   : > { %v324_v28 = vld [vmem:[#allocation4] sm:$0x1] }
  0xf5   : > { %v325_v29 = vmul.f32 0.125, %v324_v28  ;;  %v326_v30 = vmul.f32 %v323_v27, %v323_v27 }
  0xf7   : > { %v327_v31 = vsub.f32 %v325_v29, %v326_v30 }
  0xf9   : > { %v328_v32 = vmax.f32 %v327_v31, 0.0 }
  0xfb   : > { %v330_v33 = vadd.f32 1e-05, %v328_v32 }
  0xfd   : > { %668 = vrsqrt.f32 %v330_v33 }
 0x10a   : > { %v669_v35 = vpop.eup %668 }
 0x10b   : > { %v332_v36 = vmul.f32 %v669_v35, %v329_v34 }
 0x10d   : > { %v334_v38 = vmul.f32 %v332_v36, %v323_v27  ;;  %336 = vst [vmem:[#allocation3] sm:$0x1] %v332_v36 }
 0x10f   : > { %v335_v39 = vsub.f32 %v333_v37, %v334_v38 }
 0x111   : > { %337 = vst [vmem:[#allocation4] sm:$0x1] %v335_v39 }
 0x112 PF: > { %p570_p5 = scmp.ne.s32.totalorder %s720_s15, 1 }
 0x114   : > { %341 = sbr.rel (%p570_p5) target bundleno = 513 (0x201), region = 52 }
 0x119   : > { %v670_v40 = vld [vmem:[%s853_s2 + $0x38] sm:$0xff]   ;;  %v732_v41 = vmov 0.0   ;;  %v671_v42 = vld [vmem:[%s853_s2 + $0x30] sm:$0xff]   ;;  %vm733_vm3 = vmmov 0   ;;  %v672_v43 = vld [vmem:[%s853_s2 + $0x28] sm:$0xff]   ;;  %vm472_vm4 = vcmask 130048  }
 0x11a   : > { %606 = vmatprep.subr.bf16.mxu0 %v732_v41  ;;  %622 = vmatprep.mubr.msk.bf16.mxu0 %vm733_vm3, %v732_v41  ;;  %v673_v44 = vld [vmem:[%s853_s2 + $0x20] sm:$0xff]   ;;  %v674_v45 = vld [vmem:[%s853_s2 + $0x18] sm:$0xff]   ;;  %v571_v47 = vld [vmem:[#allocation3] ss:$0 sm:$0xff] }
 0x11b   : > { %607 = vmatpush3.bf16.msra.mxu0 %v670_v40  ;;  %v344_v46 = vld [vmem:[#allocation2] sm:$0xff]  ;;  %v675_v49 = vld [vmem:[%s853_s2 + $0x10] sm:$0xff]   ;;  %v572_v50 = vld [vmem:[#allocation4] ss:$0 sm:$0xff] }
 0x11c   : > { %608 = vmatprep.subr.bf16.mxu0 %v732_v41  ;;  %v353_v48 = vmul.f32 %v571_v47, %v344_v46  ;;  %v676_v52 = vld [vmem:[%s853_s2 + $0x8] sm:$0xff]   ;;  %v677_v54 = vld [vmem:[%s853_s2] sm:$0xff]  }
 0x11d   : > { %v573_v56 = vld [vmem:[%s854_s3 + $0x2] ss:$0 sm:$0xff] }
 0x11e   : > { %v360_v51 = vadd.f32 %v572_v50, %v353_v48 }
 0x11f   : > { %609 = vmatpush3.bf16.msra.mxu0 %v671_v42 }
 0x120   : > { %610 = vmatprep.subr.bf16.mxu0 %v732_v41  ;;  %v361_v53 = vmax.f32 %v360_v51, 0.0 }
 0x122   : > { %v362_v55 = vpack.c.bf16 %v361_v53, %v361_v53 }
 0x123   : > { %611 = vmatpush3.bf16.msra.mxu0 %v672_v43 }
 0x124   : > { %612 = vmatprep.subr.bf16.mxu0 %v732_v41 }
 0x127   : > { %613 = vmatpush3.bf16.msra.mxu0 %v673_v44 }
 0x128   : > { %614 = vmatprep.subr.bf16.mxu0 %v732_v41 }
 0x12b   : > { %615 = vmatpush3.bf16.msra.mxu0 %v674_v45 }
 0x12c   : > { %616 = vmatprep.subr.bf16.mxu0 %v732_v41 }
 0x12f   : > { %617 = vmatpush3.bf16.msra.mxu0 %v675_v49 }
 0x130   : > { %618 = vmatprep.subr.bf16.mxu0 %v732_v41 }
 0x133   : > { %619 = vmatpush3.bf16.msra.mxu0 %v676_v52 }
 0x134   : > { %620 = vmatprep.subr.bf16.mxu0 %v732_v41 }
 0x137   : > { %621 = vmatpush3.bf16.msra.mxu0 %v677_v54 }
 0x13a   : > { %623 = vmatmul.mubr.bf16.vlgmr.msra.gmra.mxu0 %v362_v55 }
 0x1fa   : > { %v466_v57 = vpop.f32.mrf.mxu0 }
 0x1fb   : > { %v467_v58 = vadd.f32 %v573_v56, %v466_v57 }
 0x1fc   : > { %v624_v59 = vpop.f32.mrf.mxu0 }
 0x1fd   : > { %473 = vst.msk [vmem:[#allocation5] sm:$0xff] %vm472_vm4, %v467_v58 }
 0x1fe   : > { %v469_v60 = vpop.f32.mrf.mxu0 }
 0x200   : > { %v625_v61 = vpop.f32.mrf.mxu0 }
 0x201 PF: > { %p828_p6 = scmp.eq.s32.totalorder %s560_s18, 1  ;;  %s734_s29 = smov [#allocation5]  }
 0x202   : > { %s489_s30 = sshll.u32 %s734_s29, 4  ;;  %s490_s30 = int_to_ptr.vmem [resolvable:$true] %s489_s30 }
 0x203   : > { %s678_s5 = scalar_lea.vmem %s490_s30, 128  ;;  %s684_s6 = scalar_lea.vmem %s490_s30, 256 }
 0x204   : > { %p679_p7 = scmp.ne.s32.totalorder %s490_s30, %s678_s5  ;;  %p685_p10 = scmp.lt.s32.totalorder %s490_s30, %s490_s30 }
 0x205   : > { %p686_p11 = scmp.lt.s32.totalorder %s684_s6, %s678_s5 }
 0x206   : > { %p680_p8 = pnand %p679_p7, %p828_p6 }
 0x207   : > { %p687_p12 = por %p686_p11, %p685_p10 }
 0x208   : > { %p681_p9 = pneg %p680_p8 }
 0x20a   : > { %p688_p13 = pnand %p687_p12, %p681_p9 }
 0x20c   : > { %691 = shalt.err (!%p688_p13)
}
 0x20d   : > { %627 = dma.vmem_to_hbm [thread:$0]  (%p828_p6), %s490_s30, 128, %s855_s4, [#allocation6]  }
 0x20e PF: > { %p635_p0 = scmp.ge.s32.totalorder %s728_s17, 2  ;;  %p636_p1 = scmp.eq.s32.totalorder %s561_s19, 1 }
 0x210   : > { %p631_p2 = pnand %p636_p1, %p635_p0 }
 0x212   : > { %p632_p3 = pneg %p631_p2 }
 0x214   : > { %715 = dma.done.wait (%p632_p3), [#allocation6], 128  }
 0x215   : > { %717 = vsyncadd (%p632_p3), [#allocation6], 4294967168  ;;  %s17_s17 = sadd.s32 1, %s728_s17   ;;  %s857_s15 = smov %s724_s16 }
 0x216   : > { %p14_p4 = scmp.ge.s32.totalorder %s17_s17, 4   ;;  %s858_s16 = smov %s860_s20 }
 0x218   :  { %16 = sbr.rel (!%p14_p4) target bundleno = 3 (0x3), region = 89 }
 0x21d   :  { %507 = vsyncpa [#allocation6], 1 }
 0x21e   :  { %509 = vsyncpa [#allocation6 + $0x1], 1 }

</bundles_post_ra>
